<compile_context>
chip_gen: v6e
topology: v6e:2x2x1
jax: 0.10.0
libtpu: 0.0.40
codegen_flags: <defaults>
</compile_context>

<pallas_src>
import functools

import jax
import jax.numpy as jnp
from jax.experimental import pallas as pl
from jax.experimental.pallas import tpu as pltpu


def _circconv_kernel(x_ref, w_ref, b_ref, o_ref, xs_ref, *,
                     K, C_in, L, adj, dilation, KC_pad):
    # x_ref : (C_in, L)          input block for one batch element
    # w_ref : (co_t, KC_pad)     flattened weight tile (lane-dense contraction)
    # b_ref : (co_t, 1)          bias
    # o_ref : (co_t, L)          output tile
    # xs_ref: (KC_pad, L)        VMEM scratch holding the K circularly-shifted taps
    x = x_ref[...]                                     # (C_in, L)
    KC = K * C_in

    # Build the stacked (K*C_in, L) input once per step.  Tap k needs
    # xk[c, l] = x[c, (l + (k - adj)*dilation) mod L], i.e. a circular shift by
    # s = ((adj - k)*dilation) mod L, written as two static slice stores.
    for k in range(K):
        s = ((adj - k) * dilation) % L
        r0 = k * C_in
        if s == 0:
            xs_ref[r0:r0 + C_in, :] = x
        else:
            xs_ref[r0:r0 + C_in, 0:s] = x[:, L - s:]
            xs_ref[r0:r0 + C_in, s:L] = x[:, :L - s]
    if KC_pad > KC:
        # Keep the zero-padded contraction rows clean (weight columns there are 0).
        xs_ref[KC:KC_pad, :] = jnp.zeros((KC_pad - KC, L), xs_ref.dtype)

    # Single fused MXU matmul over the full K*C_in contraction, f32 accumulation.
    acc = jnp.dot(w_ref[...], xs_ref[...], preferred_element_type=jnp.float32)
    o_ref[...] = (acc + b_ref[...]).astype(o_ref.dtype)


def dilated_circ_conv(x, weight, bias, *, adj, dilation,
                      co_tile=128, compute_dtype=jnp.float32):
    """Forward pass of MyDilatedCircConv.

    x:      (B, C_in, L) float32
    weight: (C_out, C_in, 2*adj+1) float32
    bias:   (C_out,) float32
    returns (B, C_out, L) float32

    compute_dtype=jnp.bfloat16 feeds the MXU bf16 inputs (f32 accumulation) for
    higher throughput on v5e/v6e; default f32 matches PyTorch bit-for-bit-ish.
    """
    B, C_in, L = x.shape
    C_out, c_in_w, K = weight.shape
    assert c_in_w == C_in
    assert K == 2 * adj + 1
    pad = adj * dilation
    # The torch module's slicing-based circular pad is only well-defined for
    # pad <= L (otherwise x[..., -pad:] silently truncates).
    assert pad <= L, "adj * dilation must be <= L for circular padding"

    KC = K * C_in
    KC_pad = ((KC + 7) // 8) * 8   # round contraction dim up to a sublane multiple

    # (C_out, C_in, K) -> (C_out, K*C_in): contraction dim on lanes, zero-padded.
    w2d = jnp.transpose(weight, (0, 2, 1)).reshape(C_out, KC)
    if KC_pad > KC:
        w2d = jnp.pad(w2d, ((0, 0), (0, KC_pad - KC)))
    w2d = w2d.astype(compute_dtype)
    bias2d = bias.reshape(C_out, 1).astype(jnp.float32)
    x_c = x.astype(compute_dtype)

    co_t = min(co_tile, C_out)          # C_out tile -> second parallel grid axis
    NC = pl.cdiv(C_out, co_t)

    kernel = functools.partial(
        _circconv_kernel,
        K=K, C_in=C_in, L=L, adj=adj, dilation=dilation, KC_pad=KC_pad,
    )

    # TODO(synk): for very large L, add an L-tile grid axis with halo handling so
    # per-step VMEM stays within v7x's smaller (64 MiB) budget.
    return pl.pallas_call(
        kernel,
        out_shape=jax.ShapeDtypeStruct((B, C_out, L), jnp.float32),
        grid_spec=pltpu.PrefetchScalarGridSpec(
            num_scalar_prefetch=0,
            grid=(B, NC),
            in_specs=[
                # per-batch input slab (batch dim squeezed), full L
                pl.BlockSpec((None, C_in, L), lambda b, c: (b, 0, 0)),
                # lane-dense flattened weight tile, resident across b
                pl.BlockSpec((co_t, KC_pad), lambda b, c: (c, 0)),
                # bias tile
                pl.BlockSpec((co_t, 1), lambda b, c: (c, 0)),
            ],
            out_specs=pl.BlockSpec((None, co_t, L), lambda b, c: (b, c, 0)),
            scratch_shapes=[pltpu.VMEM((KC_pad, L), compute_dtype)],
        ),
        compiler_params=pltpu.CompilerParams(
            dimension_semantics=("parallel", "parallel"),
        ),
    )(x_c, w2d, bias2d)


def _reference(x, weight, bias, *, adj, dilation):
    """Pure-JAX reference matching torch semantics (concat-based circular pad)."""
    pad = adj * dilation
    xpad = jnp.concatenate([x[..., -pad:], x, x[..., :pad]], axis=-1)
    C_out, _, K = weight.shape
    L = x.shape[-1]
    B = x.shape[0]
    out = jnp.zeros((B, C_out, L), jnp.float32)
    for k in range(K):
        xk = xpad[:, :, k * dilation: k * dilation + L]               # (B, C_in, L)
        out = out + jnp.einsum("oc,bcl->bol", weight[:, :, k], xk)
    return out + bias[None, :, None]


if __name__ == "__main__":
    configs = [
        # lane-dense output (L = 128), dilation > 1
        dict(B=2, C_in=4, C_out=4, L=128, adj=4, dilation=2),
        # the original tiny shape (L = 16, C_out != C_in)
        dict(B=2, C_in=4, C_out=6, L=16, adj=4, dilation=1),
    ]

    key = jax.random.PRNGKey(0)
    for cfg in configs:
        B, C_in, C_out, L = cfg["B"], cfg["C_in"], cfg["C_out"], cfg["L"]
        adj, dilation = cfg["adj"], cfg["dilation"]
        K = 2 * adj + 1

        key, kx, kw, kb = jax.random.split(key, 4)
        x = jax.random.normal(kx, (B, C_in, L), dtype=jnp.float32)
        fan_in = C_in * K
        bound = 1.0 / (fan_in ** 0.5)
        weight = jax.random.uniform(kw, (C_out, C_in, K), minval=-bound,
                                    maxval=bound, dtype=jnp.float32)
        bias = jax.random.uniform(kb, (C_out,), minval=-bound, maxval=bound,
                                  dtype=jnp.float32)

        out = dilated_circ_conv(x, weight, bias, adj=adj, dilation=dilation)
        out = jax.block_until_ready(out)

        ref = _reference(x, weight, bias, adj=adj, dilation=dilation)
        assert out.shape == (B, C_out, L)
        assert jnp.allclose(out, ref, atol=1e-5, rtol=1e-5), cfg

    print("KERNEL_OK")
</pallas_src>

<mosaic_0001>
module attributes {stable_mosaic.version = 11 : i64} {
  func.func @_circconv_kernel(%arg0: i32, %arg1: i32, %arg2: memref<1x4x128xf32, #tpu.memory_space<vmem>>, %arg3: memref<4x40xf32, #tpu.memory_space<vmem>>, %arg4: memref<4x1xf32, #tpu.memory_space<vmem>>, %arg5: memref<1x4x128xf32, #tpu.memory_space<vmem>>, %arg6: memref<40x128xf32, #tpu.memory_space<vmem>>) attributes {dimension_semantics = [#tpu.dimension_semantics<parallel>, #tpu.dimension_semantics<parallel>], iteration_bounds = array<i64: 2, 1>, scalar_prefetch = 0 : i64, scratch_operands = 1 : i64, tpu.core_type = #tpu.core_type<tc>, window_params = [{transform_indices = @transform_0, window_bounds = array<i64: 1, 4, 128>}, {transform_indices = @transform_1, window_bounds = array<i64: 4, 40>}, {transform_indices = @transform_2, window_bounds = array<i64: 4, 1>}, {transform_indices = @transform_3, window_bounds = array<i64: 1, 4, 128>}]} {
    %c0 = arith.constant 0 : index
    %c0_0 = arith.constant 0 : index
    %c0_1 = arith.constant 0 : index
    %0 = vector.load %arg2[%c0, %c0_0, %c0_1] : memref<1x4x128xf32, #tpu.memory_space<vmem>>, vector<1x4x128xf32>
    %1 = vector.shape_cast %0 : vector<1x4x128xf32> to vector<4x128xf32>
    %2 = vector.extract_strided_slice %1 {offsets = [0, 120], sizes = [4, 8], strides = [1, 1]} : vector<4x128xf32> to vector<4x8xf32>
    %c0_2 = arith.constant 0 : index
    %c0_3 = arith.constant 0 : index
    %3 = vector.load %arg6[%c0_2, %c0_3] : memref<40x128xf32, #tpu.memory_space<vmem>>, vector<4x8xf32>
    tpu.vector_store %arg6[%c0_2, %c0_3], %2 {strides = array<i32>} : memref<40x128xf32, #tpu.memory_space<vmem>>, vector<4x8xf32>,
    %4 = vector.extract_strided_slice %1 {offsets = [0, 0], sizes = [4, 120], strides = [1, 1]} : vector<4x128xf32> to vector<4x120xf32>
    %c0_4 = arith.constant 0 : index
    %c8 = arith.constant 8 : index
    %5 = vector.load %arg6[%c0_4, %c8] : memref<40x128xf32, #tpu.memory_space<vmem>>, vector<4x120xf32>
    tpu.vector_store %arg6[%c0_4, %c8], %4 {strides = array<i32>} : memref<40x128xf32, #tpu.memory_space<vmem>>, vector<4x120xf32>,
    %6 = vector.extract_strided_slice %1 {offsets = [0, 122], sizes = [4, 6], strides = [1, 1]} : vector<4x128xf32> to vector<4x6xf32>
    %c4 = arith.constant 4 : index
    %c0_5 = arith.constant 0 : index
    %7 = vector.load %arg6[%c4, %c0_5] : memref<40x128xf32, #tpu.memory_space<vmem>>, vector<4x6xf32>
    tpu.vector_store %arg6[%c4, %c0_5], %6 {strides = array<i32>} : memref<40x128xf32, #tpu.memory_space<vmem>>, vector<4x6xf32>,
    %8 = vector.extract_strided_slice %1 {offsets = [0, 0], sizes = [4, 122], strides = [1, 1]} : vector<4x128xf32> to vector<4x122xf32>
    %c4_6 = arith.constant 4 : index
    %c6 = arith.constant 6 : index
    %9 = vector.load %arg6[%c4_6, %c6] : memref<40x128xf32, #tpu.memory_space<vmem>>, vector<4x122xf32>
    tpu.vector_store %arg6[%c4_6, %c6], %8 {strides = array<i32>} : memref<40x128xf32, #tpu.memory_space<vmem>>, vector<4x122xf32>,
    %10 = vector.extract_strided_slice %1 {offsets = [0, 124], sizes = [4, 4], strides = [1, 1]} : vector<4x128xf32> to vector<4x4xf32>
    %c8_7 = arith.constant 8 : index
    %c0_8 = arith.constant 0 : index
    %11 = vector.load %arg6[%c8_7, %c0_8] : memref<40x128xf32, #tpu.memory_space<vmem>>, vector<4x4xf32>
    tpu.vector_store %arg6[%c8_7, %c0_8], %10 {strides = array<i32>} : memref<40x128xf32, #tpu.memory_space<vmem>>, vector<4x4xf32>,
    %12 = vector.extract_strided_slice %1 {offsets = [0, 0], sizes = [4, 124], strides = [1, 1]} : vector<4x128xf32> to vector<4x124xf32>
    %c8_9 = arith.constant 8 : index
    %c4_10 = arith.constant 4 : index
    %13 = vector.load %arg6[%c8_9, %c4_10] : memref<40x128xf32, #tpu.memory_space<vmem>>, vector<4x124xf32>
    tpu.vector_store %arg6[%c8_9, %c4_10], %12 {strides = array<i32>} : memref<40x128xf32, #tpu.memory_space<vmem>>, vector<4x124xf32>,
    %14 = vector.extract_strided_slice %1 {offsets = [0, 126], sizes = [4, 2], strides = [1, 1]} : vector<4x128xf32> to vector<4x2xf32>
    %c12 = arith.constant 12 : index
    %c0_11 = arith.constant 0 : index
    %15 = vector.load %arg6[%c12, %c0_11] : memref<40x128xf32, #tpu.memory_space<vmem>>, vector<4x2xf32>
    tpu.vector_store %arg6[%c12, %c0_11], %14 {strides = array<i32>} : memref<40x128xf32, #tpu.memory_space<vmem>>, vector<4x2xf32>,
    %16 = vector.extract_strided_slice %1 {offsets = [0, 0], sizes = [4, 126], strides = [1, 1]} : vector<4x128xf32> to vector<4x126xf32>
    %c12_12 = arith.constant 12 : index
    %c2 = arith.constant 2 : index
    %17 = vector.load %arg6[%c12_12, %c2] : memref<40x128xf32, #tpu.memory_space<vmem>>, vector<4x126xf32>
    tpu.vector_store %arg6[%c12_12, %c2], %16 {strides = array<i32>} : memref<40x128xf32, #tpu.memory_space<vmem>>, vector<4x126xf32>,
    %c16 = arith.constant 16 : index
    %c0_13 = arith.constant 0 : index
    %18 = vector.load %arg6[%c16, %c0_13] : memref<40x128xf32, #tpu.memory_space<vmem>>, vector<4x128xf32>
    tpu.vector_store %arg6[%c16, %c0_13], %1 {strides = array<i32>} : memref<40x128xf32, #tpu.memory_space<vmem>>, vector<4x128xf32>,
    %19 = vector.extract_strided_slice %1 {offsets = [0, 2], sizes = [4, 126], strides = [1, 1]} : vector<4x128xf32> to vector<4x126xf32>
    %c20 = arith.constant 20 : index
    %c0_14 = arith.constant 0 : index
    %20 = vector.load %arg6[%c20, %c0_14] : memref<40x128xf32, #tpu.memory_space<vmem>>, vector<4x126xf32>
    tpu.vector_store %arg6[%c20, %c0_14], %19 {strides = array<i32>} : memref<40x128xf32, #tpu.memory_space<vmem>>, vector<4x126xf32>,
    %21 = vector.extract_strided_slice %1 {offsets = [0, 0], sizes = [4, 2], strides = [1, 1]} : vector<4x128xf32> to vector<4x2xf32>
    %c20_15 = arith.constant 20 : index
    %c126 = arith.constant 126 : index
    %22 = vector.load %arg6[%c20_15, %c126] : memref<40x128xf32, #tpu.memory_space<vmem>>, vector<4x2xf32>
    tpu.vector_store %arg6[%c20_15, %c126], %21 {strides = array<i32>} : memref<40x128xf32, #tpu.memory_space<vmem>>, vector<4x2xf32>,
    %23 = vector.extract_strided_slice %1 {offsets = [0, 4], sizes = [4, 124], strides = [1, 1]} : vector<4x128xf32> to vector<4x124xf32>
    %c24 = arith.constant 24 : index
    %c0_16 = arith.constant 0 : index
    %24 = vector.load %arg6[%c24, %c0_16] : memref<40x128xf32, #tpu.memory_space<vmem>>, vector<4x124xf32>
    tpu.vector_store %arg6[%c24, %c0_16], %23 {strides = array<i32>} : memref<40x128xf32, #tpu.memory_space<vmem>>, vector<4x124xf32>,
    %25 = vector.extract_strided_slice %1 {offsets = [0, 0], sizes = [4, 4], strides = [1, 1]} : vector<4x128xf32> to vector<4x4xf32>
    %c24_17 = arith.constant 24 : index
    %c124 = arith.constant 124 : index
    %26 = vector.load %arg6[%c24_17, %c124] : memref<40x128xf32, #tpu.memory_space<vmem>>, vector<4x4xf32>
    tpu.vector_store %arg6[%c24_17, %c124], %25 {strides = array<i32>} : memref<40x128xf32, #tpu.memory_space<vmem>>, vector<4x4xf32>,
    %27 = vector.extract_strided_slice %1 {offsets = [0, 6], sizes = [4, 122], strides = [1, 1]} : vector<4x128xf32> to vector<4x122xf32>
    %c28 = arith.constant 28 : index
    %c0_18 = arith.constant 0 : index
    %28 = vector.load %arg6[%c28, %c0_18] : memref<40x128xf32, #tpu.memory_space<vmem>>, vector<4x122xf32>
    tpu.vector_store %arg6[%c28, %c0_18], %27 {strides = array<i32>} : memref<40x128xf32, #tpu.memory_space<vmem>>, vector<4x122xf32>,
    %29 = vector.extract_strided_slice %1 {offsets = [0, 0], sizes = [4, 6], strides = [1, 1]} : vector<4x128xf32> to vector<4x6xf32>
    %c28_19 = arith.constant 28 : index
    %c122 = arith.constant 122 : index
    %30 = vector.load %arg6[%c28_19, %c122] : memref<40x128xf32, #tpu.memory_space<vmem>>, vector<4x6xf32>
    tpu.vector_store %arg6[%c28_19, %c122], %29 {strides = array<i32>} : memref<40x128xf32, #tpu.memory_space<vmem>>, vector<4x6xf32>,
    %31 = vector.extract_strided_slice %1 {offsets = [0, 8], sizes = [4, 120], strides = [1, 1]} : vector<4x128xf32> to vector<4x120xf32>
    %c32 = arith.constant 32 : index
    %c0_20 = arith.constant 0 : index
    %32 = vector.load %arg6[%c32, %c0_20] : memref<40x128xf32, #tpu.memory_space<vmem>>, vector<4x120xf32>
    tpu.vector_store %arg6[%c32, %c0_20], %31 {strides = array<i32>} : memref<40x128xf32, #tpu.memory_space<vmem>>, vector<4x120xf32>,
    %33 = vector.extract_strided_slice %1 {offsets = [0, 0], sizes = [4, 8], strides = [1, 1]} : vector<4x128xf32> to vector<4x8xf32>
    %c32_21 = arith.constant 32 : index
    %c120 = arith.constant 120 : index
    %34 = vector.load %arg6[%c32_21, %c120] : memref<40x128xf32, #tpu.memory_space<vmem>>, vector<4x8xf32>
    tpu.vector_store %arg6[%c32_21, %c120], %33 {strides = array<i32>} : memref<40x128xf32, #tpu.memory_space<vmem>>, vector<4x8xf32>,
    %cst = arith.constant 0.000000e+00 : f32
    %35 = vector.broadcast %cst : f32 to vector<4x128xf32>
    %c36 = arith.constant 36 : index
    %c0_22 = arith.constant 0 : index
    %36 = vector.load %arg6[%c36, %c0_22] : memref<40x128xf32, #tpu.memory_space<vmem>>, vector<4x128xf32>
    tpu.vector_store %arg6[%c36, %c0_22], %35 {strides = array<i32>} : memref<40x128xf32, #tpu.memory_space<vmem>>, vector<4x128xf32>,
    %c0_23 = arith.constant 0 : index
    %c0_24 = arith.constant 0 : index
    %37 = vector.load %arg3[%c0_23, %c0_24] : memref<4x40xf32, #tpu.memory_space<vmem>>, vector<4x40xf32>
    %c0_25 = arith.constant 0 : index
    %c0_26 = arith.constant 0 : index
    %38 = vector.load %arg6[%c0_25, %c0_26] : memref<40x128xf32, #tpu.memory_space<vmem>>, vector<40x128xf32>
    %cst_27 = arith.constant dense<0.000000e+00> : vector<4x128xf32>
    %39 = tpu.matmul %37, %38, %cst_27 {dimension_numbers = #tpu.dot_dimension_numbers<[1], [0], [0], [1], [0, 0, 1, 1], [], []>} : vector<4x40xf32>, vector<40x128xf32>, vector<4x128xf32> -> vector<4x128xf32>
    %c0_28 = arith.constant 0 : index
    %c0_29 = arith.constant 0 : index
    %40 = vector.load %arg4[%c0_28, %c0_29] : memref<4x1xf32, #tpu.memory_space<vmem>>, vector<4x1xf32>
    %41 = vector.broadcast %40 : vector<4x1xf32> to vector<4x128xf32>
    %42 = arith.addf %39, %41 : vector<4x128xf32>
    %c0_30 = arith.constant 0 : index
    %c0_31 = arith.constant 0 : index
    %c0_32 = arith.constant 0 : index
    %43 = vector.load %arg5[%c0_30, %c0_31, %c0_32] : memref<1x4x128xf32, #tpu.memory_space<vmem>>, vector<1x4x128xf32>
    %44 = vector.shape_cast %43 : vector<1x4x128xf32> to vector<4x128xf32>
    %45 = vector.shape_cast %42 : vector<4x128xf32> to vector<1x4x128xf32>
    tpu.vector_store %arg5[%c0_30, %c0_31, %c0_32], %45 {strides = array<i32>} : memref<1x4x128xf32, #tpu.memory_space<vmem>>, vector<1x4x128xf32>,
    return
  }
  func.func @transform_0(%arg0: i32, %arg1: i32) -> (i32, i32, i32) {
    %c0_i32 = arith.constant 0 : i32
    %c0_i32_0 = arith.constant 0 : i32
    %c0_i32_1 = arith.constant 0 : i32
    return %arg0, %c0_i32, %c0_i32_0 : i32, i32, i32
  }
  func.func @transform_1(%arg0: i32, %arg1: i32) -> (i32, i32) {
    %c0_i32 = arith.constant 0 : i32
    %c0_i32_0 = arith.constant 0 : i32
    return %arg1, %c0_i32 : i32, i32
  }
  func.func @transform_2(%arg0: i32, %arg1: i32) -> (i32, i32) {
    %c0_i32 = arith.constant 0 : i32
    %c0_i32_0 = arith.constant 0 : i32
    return %arg1, %c0_i32 : i32, i32
  }
  func.func @transform_3(%arg0: i32, %arg1: i32) -> (i32, i32, i32) {
    %c0_i32 = arith.constant 0 : i32
    %c0_i32_0 = arith.constant 0 : i32
    return %arg0, %arg1, %c0_i32 : i32, i32, i32
  }
}

</mosaic_0001>

<bundles_post_ra>
// kernel: tpu_custom_call.1
= control target key start
LH: loop header
LB: loop body
LE: loop exit
PB: predicated region body
PF: predicated region fallthrough
CT: control target
= control target key end

     0   :  { %8 = vsyncpa [#allocation4], 0  ;;  %s914_s0 = inlined_call_operand.hbm [shape: f32[2,4,128], index: 0, kind: input, shape index: {}]   ;;  %s915_s1 = inlined_call_operand.vmem [shape: f32[4,40], index: 1, kind: input, shape index: {}]   ;;  %s916_s2 = inlined_call_operand.vmem [shape: f32[4,1], index: 2, kind: input, shape index: {}]   ;;  %s917_s3 = inlined_call_operand.hbm [shape: f32[2,4,128], index: 3, kind: output, shape index: {}]  }
   0x1   :  { %10 = vsyncpa [#allocation4 + $0x1], 0 }
   0x2   :  { %11 = vsyncpa [#allocation5], 0 }
   0x3   :  { %13 = vsyncpa [#allocation5 + $0x1], 0  ;;  %s757_s12 = smov 0   ;;  %s759_s13 = smov 0  }
   0x4   :  { %s761_s14 = smov 0   ;;  %s763_s15 = smov 0  }
   0x5   :  { %s765_s16 = smov 0   ;;  %s767_s17 = smov 0  }
   0x6 LB: > { %s505_s18 = sadd.s32 4294967295, %s722_s17   ;;  %s506_s19 = sadd.s32 4294967294, %s722_s17   ;;  %s722_s17 = sphi %s767_s17, %s19_s17   ;;  %s718_s16 = sphi %s765_s16, %s929_s16   ;;  %s714_s15 = sphi %s763_s15, %s928_s15   ;;  %s710_s14 = sphi %s761_s14, %s927_s14   ;;  %s706_s13 = sphi %s759_s13, %s926_s13   ;;  %s702_s12 = sphi %s757_s12, %s925_s12  }
   0x7   : > { %s31_s20 = sadd.s32 1, %s718_s16  ;;  %s38_s21 = sadd.s32 1, %s710_s14 }
   0x8   : > { %p33_p0 = scmp.ge.s32.totalorder %s31_s20, 2  ;;  %p45_p1 = scmp.ne.s32.totalorder %s710_s14, %s706_s13 }
   0x9   : > { %p46_p2 = scmp.eq.s32.totalorder %s722_s17, 0  ;;  %p51_p3 = scmp.ne.s32.totalorder %s706_s13, %s702_s12 }
   0xa   : > { %s931_s20 = smov (%p33_p0, %s31_s20), 0  ;;  %p52_p5 = scmp.eq.s32.totalorder %s505_s18, 0 }
   0xb   : > { %p798_p4 = por %p46_p2, %p45_p1  ;;  %s35_s23 = ssub.s32 %s718_s16, %s931_s20 }
   0xc   : > { %p129_p6 = scmp.eq.s32.totalorder %s505_s18, 1  ;;  %p36_p7 = scmp.eq.s32.totalorder %s35_s23, 0 }
   0xd   : > { %p804_p8 = por %p52_p5, %p51_p3  ;;  %p135_p10 = scmp.eq.s32.totalorder %s506_s19, 1 }
   0xe   : > { %p808_p9 = por %p129_p6, %p45_p1  ;;  %p552_p13 = scmp.lt.s32.totalorder %s722_s17, 2 }
   0xf   : > { %s813_s26 = scalar_select %p36_p7, %s710_s14, %s38_s21  }
  0x10   : > { %p815_p11 = por %p135_p10, %p51_p3  ;;  %s169_s28 = sand.u32 1, %s710_s14  }
  0x11   : > { %s511_s29 = sshll.u32 %s169_s28, 2  ;;  %s512_s30 = sshll.u32 %s718_s16, 6 }
  0x12   : > { %s921_s27 = scalar_select %p815_p11, 1, 0 }
  0x13   : > { %s178_s6 = scalar_lea.hbm %s914_s0, %s512_s30  ;;  %s173_s7 = scalar_lea.vmem [#allocation3], %s511_s29 }
  0x14   : > { %s180_s8 = sshll.u32 %s173_s7, 4  ;;  %p828_p0 = pnand %p552_p13, %p798_p4  ;;  %s181_s8 = int_to_ptr.vmem [resolvable:$true] %s180_s8 }
  0x15   : > { %p513_p1 = scmp.ge.s32.totalorder %s722_s17, 1  ;;  %p185_p2 = scmp.lt.s32.totalorder %s722_s17, 3 }
  0x16   : > { %s170_s10 = scalar_lea.sflag [#allocation4], %s169_s28  ;;  %p616_p3 = pneg %p828_p0 }
  0x17   : > { %s627_s11 = scalar_lea.vmem %s181_s8, 64  ;;  %s724_s18 = smov [#allocation3]  }
  0x18   : > { %p628_p5 = scmp.ne.s32.totalorder %s181_s8, %s627_s11  ;;  %s632_s19 = sshll.u32 %s724_s18, 4  ;;  %s633_s19 = int_to_ptr.vmem [resolvable:$false] %s632_s19 }
  0x19   : > { %s634_s21 = scalar_lea.vmem %s633_s19, 128  ;;  %p635_p10 = scmp.lt.s32.totalorder %s181_s8, %s633_s19 }
  0x1a   : > { %p630_p6 = pnand %p628_p5, %p616_p3  ;;  %p636_p12 = scmp.lt.s32.totalorder %s634_s21, %s627_s11 }
  0x1c   : > { %p631_p7 = pneg %p630_p6  ;;  %p637_p4 = por %p636_p12, %p635_p10 }
  0x1e   : > { %p638_p13 = pnand %p637_p4, %p631_p7 }
  0x20   : > { %641 = shalt.err (!%p638_p13)
}
  0x21   : > { %547 = dma.hbm_to_vmem [thread:$0]  (!%p828_p0), %s178_s6, 64, %s181_s8, %s170_s10  }
  0x22   : > { %p186_p11 = pnand %p513_p1, %p185_p2 }
  0x23   : > { %s843_s22 = sand.u32 (!%p186_p11), 1, %s706_s13  }
  0x24   : > { %189 = sbr.rel (%p186_p11) target bundleno = 390 (0x186), region = 32  ;;  %s514_s23 = sshll.u32 (!%p186_p11), %s843_s22, 2 }
  0x25   : > { %s192_s28 = scalar_lea.sflag (!%p186_p11), [#allocation4], %s843_s22  ;;  %s195_s29 = scalar_lea.vmem (!%p186_p11), [#allocation3], %s514_s23 }
  0x29   : > { %693 = dma.done.wait (%p804_p8), %s192_s28, 64  }
  0x2a   : > { %695 = vsyncadd (%p804_p8), %s192_s28, 4294967232  ;;  %v725_v0 = vmov 0.0   ;;  %v234_v1 = vld [vmem:[%s195_s29] sm:$0xf]  ;;  %s726_s30 = smov 122   ;;  %s727_s4 = smov 120  }
  0x2b   : > { %293 = vst [vmem:[#allocation2 + $0x24] sm:$0xf] %v725_v0  ;;  %527 = vmatprep.subr.mxu0 %v725_v0  ;;  %279 = vrot.lane.b32.xlu1 %v234_v1, %s726_s30  ;;  %264 = vst [vmem:[#allocation2 + $0x10] sm:$0xf] %v234_v1  ;;  %s728_s5 = smov 126   ;;  %s729_s6 = smov 124  }
  0x2c   : > { %286 = vrot.lane.b32.xlu0 %v234_v1, %s727_s4  ;;  %s730_s7 = smov 2   ;;  %s731_s8 = smov 4   ;;  %vm732_vm0 = vmmov 0   ;;  %v733_v2 = vmov 0   ;;  %v300_v3 = vld [vmem:[%s916_s2] sm:$0xf] }
  0x2d   : > { %537 = vmatprep.mubr.msk.f32.mxu0 %vm732_vm0, %v725_v0  ;;  %613 = vset.pattern.permute.xlu0 %v733_v2  ;;  %s734_s24 = smov 6   ;;  %s735_s9 = smov 8   ;;  %vm282_vm1 = vcmask 994304   ;;  %vm289_vm2 = vcmask 977920   ;;  %vm284_vm3 = vcmask 1044432   ;;  %vm291_vm4 = vcmask 1044416  }
  0x2e   : > { %vm268_vm5 = vcmask 1027072   ;;  %vm275_vm6 = vcmask 1010688   ;;  %vm270_vm7 = vcmask 1044464   ;;  %vm277_vm8 = vcmask 1044448   ;;  %v294_v16 = vld [vmem:[%s915_s1] sm:$0xf] }
  0x2f   : > { %265 = vrot.lane.b32.xlu1 %v234_v1, %s728_s5  ;;  %vm260_vm9 = vcmask 11264   ;;  %vm253_vm10 = vcmask 27648   ;;  %vm262_vm11 = vcmask 1043472   ;;  %vm255_vm12 = vcmask 1043488   ;;  %s518_s21 = sshll.u32 %s714_s15, 6  ;;  %s225_s28 = scalar_lea.vmem [#allocation6], %s514_s23 }
  0x30   : > { %272 = vrot.lane.b32.xlu0 %v234_v1, %s729_s6  ;;  %vm246_vm13 = vcmask 44032   ;;  %vm239_vm14 = vcmask 60416   ;;  %vm248_vm15 = vcmask 1043504   ;;  %vm241_vm0 = vcmask 1043520   ;;  %s396_s29 = sshll.u32 %s225_s28, 4  ;;  %s872_s5 = scalar_lea.hbm %s917_s3, %s518_s21  ;;  %s397_s29 = int_to_ptr.vmem [resolvable:$true] %s396_s29 }
  0x31   : > { %s382_s6 = scalar_lea.sflag [#allocation5], %s843_s22  ;;  %s736_s15 = smov [#allocation6]  }
  0x33   : > { %257 = vrot.lane.b32.xlu1 %v234_v1, %s730_s7  ;;  %s642_s7 = scalar_lea.vmem %s397_s29, 64 }
  0x34   : > { %250 = vrot.lane.b32.xlu0 %v234_v1, %s731_s8  ;;  %p643_p8 = scmp.ne.s32.totalorder %s397_s29, %s642_s7  ;;  %s646_s8 = sshll.u32 %s736_s15, 4  ;;  %s647_s8 = int_to_ptr.vmem [resolvable:$false] %s646_s8 }
  0x35   : > { %s648_s23 = scalar_lea.vmem %s647_s8, 128  ;;  %p649_p0 = scmp.lt.s32.totalorder %s397_s29, %s647_s8 }
  0x36   : > { %p644_p11 = pnand %p643_p8, %p808_p9  ;;  %p650_p1 = scmp.lt.s32.totalorder %s648_s23, %s642_s7 }
  0x37   : > { %243 = vrot.lane.b32.xlu1 %v234_v1, %s734_s24 }
  0x38   : > { %236 = vrot.lane.b32.xlu0 %v234_v1, %s735_s9  ;;  %p645_p12 = pneg %p644_p11  ;;  %p651_p2 = por %p650_p1, %p649_p0 }
  0x3a   : > { %p652_p3 = pnand %p651_p2, %p645_p12 }
  0x3c   : > { %303 = vperm.xlu0 %613, %v300_v3  }
  0x9d   : > { %v280_v4 = vpop.permute.xlu1 %279 }
  0x9e   : > { %v287_v5 = vpop.permute.xlu0 %286  ;;  %283 = vst.msk [vmem:[#allocation2 + $0x1c] sm:$0xf] %vm282_vm1, %v280_v4  ;;  %vm306_vm1 = vcmask 326656  }
  0x9f   : > { %290 = vst.msk [vmem:[#allocation2 + $0x20] sm:$0xf] %vm289_vm2, %v287_v5 }
  0xa0   : > { %285 = vst.msk [vmem:[#allocation2 + $0x1c] sm:$0xf] %vm284_vm3, %v280_v4 }
  0xa1   : > { %292 = vst.msk [vmem:[#allocation2 + $0x20] sm:$0xf] %vm291_vm4, %v287_v5  ;;  %v266_v6 = vpop.permute.xlu1 %265 }
  0xa2   : > { %v273_v7 = vpop.permute.xlu0 %272  ;;  %269 = vst.msk [vmem:[#allocation2 + $0x14] sm:$0xf] %vm268_vm5, %v266_v6 }
  0xa3   : > { %276 = vst.msk [vmem:[#allocation2 + $0x18] sm:$0xf] %vm275_vm6, %v273_v7 }
  0xa4   : > { %271 = vst.msk [vmem:[#allocation2 + $0x14] sm:$0xf] %vm270_vm7, %v266_v6 }
  0xa5   : > { %278 = vst.msk [vmem:[#allocation2 + $0x18] sm:$0xf] %vm277_vm8, %v273_v7  ;;  %v258_v8 = vpop.permute.xlu1 %257 }
  0xa6   : > { %v251_v9 = vpop.permute.xlu0 %250  ;;  %261 = vst.msk [vmem:[#allocation2 + $0xc] sm:$0xf] %vm260_vm9, %v258_v8 }
  0xa7   : > { %254 = vst.msk [vmem:[#allocation2 + $0x8] sm:$0xf] %vm253_vm10, %v251_v9 }
  0xa8   : > { %v299_v10 = vld [vmem:[#allocation2 + $0x20] sm:$0xff]  ;;  %263 = vst.msk [vmem:[#allocation2 + $0xc] sm:$0xf] %vm262_vm11, %v258_v8 }
  0xa9   : > { %256 = vst.msk [vmem:[#allocation2 + $0x8] sm:$0xf] %vm255_vm12, %v251_v9  ;;  %528 = vmatpush3.msra.mxu0 %v299_v10  ;;  %v244_v11 = vpop.permute.xlu1 %243 }
  0xaa   : > { %529 = vmatprep.subr.mxu0 %v725_v0  ;;  %v237_v12 = vpop.permute.xlu0 %236  ;;  %247 = vst.msk [vmem:[#allocation2 + $0x4] sm:$0xf] %vm246_vm13, %v244_v11 }
  0xab   : > { %240 = vst.msk [vmem:[#allocation2] sm:$0xf] %vm239_vm14, %v237_v12  ;;  %v297_v14 = vld [vmem:[#allocation2 + $0x10] sm:$0xff] }
  0xac   : > { %v298_v13 = vld [vmem:[#allocation2 + $0x18] sm:$0xff]  ;;  %249 = vst.msk [vmem:[#allocation2 + $0x4] sm:$0xf] %vm248_vm15, %v244_v11 }
  0xad   : > { %242 = vst.msk [vmem:[#allocation2] sm:$0xf] %vm241_vm0, %v237_v12  ;;  %530 = vmatpush3.msra.mxu0 %v298_v13 }
  0xae   : > { %531 = vmatprep.subr.mxu0 %v725_v0 }
  0xaf   : > { %532 = vmatpush3.msra.mxu0 %v297_v14 }
  0xb0   : > { %533 = vmatprep.subr.mxu0 %v725_v0  ;;  %v296_v15 = vld [vmem:[#allocation2 + $0x8] sm:$0xff] }
  0xb1   : > { %534 = vmatpush3.msra.mxu0 %v296_v15 }
  0xb2   : > { %535 = vmatprep.subr.mxu0 %v725_v0 }
  0xb4   : > { %v295_v17 = vld [vmem:[#allocation2] sm:$0xff] }
  0xb5   : > { %536 = vmatpush3.msra.mxu0 %v295_v17 }
  0xb6   : > { %538 = vmatmul.mubr.msk.f32.vlgmr.msra.gmra.mxu0 %vm306_vm1, %v294_v16 }
  0xb7   : > { %v304_v18 = vpop.permute.xlu0 %303 }
 0x176   : > { %v376_v19 = vpop.f32.mrf.mxu0 }
 0x177   : > { %v377_v20 = vadd.f32 %v376_v19, %v304_v18 }
 0x178   : > { %v539_v21 = vpop.f32.mrf.mxu0 }
 0x179   : > { %380 = vst [vmem:[%s225_s28] sm:$0xf] %v377_v20 }
 0x17a   : > { %655 = shalt.err (!%p652_p3)
}
 0x17b   : > { %s656_s24 = scalar_lea.hbm %s872_s5, 64  ;;  %s660_s10 = scalar_lea.hbm %s917_s3, 128 }
 0x17c   : > { %p657_p5 = scmp.ne.s32.totalorder %s872_s5, %s656_s24  ;;  %p661_p10 = scmp.lt.s32.totalorder %s872_s5, %s917_s3 }
 0x17d   : > { %p662_p4 = scmp.lt.s32.totalorder %s660_s10, %s656_s24 }
 0x17e   : > { %p658_p6 = pnand %p657_p5, %p808_p9 }
 0x17f   : > { %p663_p13 = por %p662_p4, %p661_p10 }
 0x180   : > { %p659_p7 = pneg %p658_p6 }
 0x182   : > { %p664_p8 = pnand %p663_p13, %p659_p7 }
 0x184   : > { %667 = shalt.err (!%p664_p8)
}
 0x185   : > { %542 = dma.vmem_to_hbm [thread:$0]  (%p808_p9), %s397_s29, 64, %s872_s5, %s382_s6  }
 0x186 PF: > { %s408_s19 = sand.u32 1, %s702_s12   ;;  %p923_p11 = scmp.ne.s32.totalorder %s921_s27, 0 }
 0x187   : > { %p924_p12 = scmp.ge.s32.totalorder %s722_s17, 2  ;;  %s409_s21 = scalar_lea.sflag [#allocation5], %s408_s19 }
 0x189   : > { %p549_p0 = pnand %p924_p12, %p923_p11 }
 0x18b   : > { %p550_p1 = pneg %p549_p0 }
 0x18d   : > { %697 = dma.done.wait (%p550_p1), %s409_s21, 64  }
 0x18e   : > { %699 = vsyncadd (%p550_p1), %s409_s21, 4294967232  ;;  %s19_s17 = sadd.s32 1, %s722_s17   ;;  %s925_s12 = smov %s706_s13 }
 0x18f   : > { %p16_p2 = scmp.ge.s32.totalorder %s19_s17, 4   ;;  %s926_s13 = smov %s710_s14 }
 0x190   : > { %s927_s14 = smov %s813_s26  ;;  %s928_s15 = smov %s718_s16 }
 0x191   : > { %s929_s16 = smov %s931_s20  ;;  %18 = sbr.rel (!%p16_p2) target bundleno = 6 (0x6), region = 83 }
 0x196   :  { %414 = vsyncpa [#allocation4], 1 }
 0x197   :  { %416 = vsyncpa [#allocation4 + $0x1], 1 }
 0x198   :  { %417 = vsyncpa [#allocation5], 1 }
 0x199   :  { %419 = vsyncpa [#allocation5 + $0x1], 1 }

</bundles_post_ra>
